<compile_context>
chip_gen: v7x
topology: tpu7x:2x2x1
jax: 0.10.0
libtpu: 0.0.40
codegen_flags: <defaults>
</compile_context>

<pallas_src>
import math

import jax
import jax.numpy as jnp
from jax import lax
from jax.experimental import pallas as pl
from jax.experimental.pallas import tpu as pltpu


def _round_up(x, m):
    return ((x + m - 1) // m) * m


def _vmem_limit_bytes(required_bytes):
    """Clamp a footprint-derived VMEM request against the chip's physical VMEM."""
    phys = 64 * 1024 * 1024  # conservative default = v7x per-TensorCore VMEM
    try:
        phys = int(getattr(pltpu.get_tpu_info(), "vmem_capacity_bytes", phys))
    except Exception:
        pass
    cap = int(phys * 0.85)
    return int(min(cap, max(32 * 1024 * 1024, int(required_bytes))))


# -----------------------------------------------------------------------------
# Stage 1: fused per-node projection   Pab = h @ [W1a | W1b] + [b1 | 0]
# -----------------------------------------------------------------------------
def _node_proj_kernel(h_ref, w_ref, b_ref, pa_ref, pb_ref):
    pab = jnp.dot(h_ref[...], w_ref[...],
                  preferred_element_type=jnp.float32) + b_ref[...]
    h_pad = pa_ref.shape[1]
    pa_ref[...] = pab[:, :h_pad]     # src half (b1 folded in)
    pb_ref[...] = pab[:, h_pad:]     # dst half


# -----------------------------------------------------------------------------
# Stage 2a: edge scoring via MXU one-hot gather (small/moderate node counts)
# -----------------------------------------------------------------------------
def _edge_score_onehot_kernel(src_ref, dst_ref,            # (TILE_E, 1) int32 VMEM blocks
                              pa_ref, pb_ref,              # (N_pad, H_pad) resident tables
                              w2_ref, b2_ref,              # (1, H_pad) VMEM, (1,) SMEM
                              out_ref):                    # (1, TILE_E) lane-dense scores
    tile_e = src_ref.shape[0]
    n_pad = pa_ref.shape[0]
    node_iota = lax.broadcasted_iota(jnp.int32, (tile_e, n_pad), 1)
    onehot_s = (node_iota == src_ref[...]).astype(jnp.float32)   # (TILE_E, N_pad)
    onehot_d = (node_iota == dst_ref[...]).astype(jnp.float32)
    gath = (jnp.dot(onehot_s, pa_ref[...], preferred_element_type=jnp.float32)
            + jnp.dot(onehot_d, pb_ref[...], preferred_element_type=jnp.float32))
    z = jnp.maximum(gath, 0.0)                                   # b1 already in Pa
    scores = jnp.einsum("oh,eh->oe", w2_ref[...], z,
                        preferred_element_type=jnp.float32)      # (1, TILE_E)
    out_ref[...] = scores + b2_ref[0]


# -----------------------------------------------------------------------------
# Stage 2b: edge scoring via batched 8-row gather (larger node counts)
# -----------------------------------------------------------------------------
def _edge_score_loop_kernel(src_ref, dst_ref,               # scalar prefetch (SMEM, (E_pad,))
                            pa_ref, pb_ref, w2_ref, b2_ref,  # inputs
                            out_ref,                         # (1, TILE_E)
                            gath_ref):                       # VMEM scratch (TILE_E, H_pad)
    tile_e = gath_ref.shape[0]
    base_e = pl.multiple_of(pl.program_id(0) * tile_e, tile_e)

    def gather8(g, carry):
        row0 = pl.multiple_of(g * 8, 8)
        rows = []
        for r in range(8):                       # static 8-way unroll within the group
            s = src_ref[base_e + row0 + r]
            d = dst_ref[base_e + row0 + r]
            rows.append(pa_ref[pl.ds(s, 1), :] + pb_ref[pl.ds(d, 1), :])
        # One full (8, H_pad) slab store instead of eight single-row masked stores.
        gath_ref[pl.ds(row0, 8), :] = jnp.concatenate(rows, axis=0)
        return carry

    lax.fori_loop(0, tile_e // 8, gather8, 0, unroll=4)

    z = jnp.maximum(gath_ref[...], 0.0)
    scores = jnp.einsum("oh,eh->oe", w2_ref[...], z,
                        preferred_element_type=jnp.float32)
    out_ref[...] = scores + b2_ref[0]


# -----------------------------------------------------------------------------
# Wrapper
# -----------------------------------------------------------------------------
def mlp_predictor_pallas(h, src_idx, dst_idx, W1, b1, W2, b2, *,
                         tile_e=512, gather="auto", onehot_max_nodes=4096):
    """h: [N, F] node features; src_idx/dst_idx: [E] int edge endpoints.
    W1: [H, 2*F] (torch Linear layout), b1: [H], W2: [1, H], b2: [1].
    Returns per-edge scores [E] float32."""
    N, F = h.shape
    H = W1.shape[0]
    E = src_idx.shape[0]
    f32 = jnp.float32

    # Hardware-aligned padded shapes (zero padding is numerically inert).
    F_pad = _round_up(F, 128)
    H_pad = _round_up(H, 128)
    N_pad = _round_up(N, 128)
    tile_n = min(1024, N_pad)
    while N_pad % tile_n:                 # largest 128-multiple tile that divides N_pad
        tile_n -= 128
    TILE_E = max(128, _round_up(tile_e, 128))
    E_pad = _round_up(max(E, 1), TILE_E)

    if gather == "auto":
        gather = "onehot" if N_pad <= onehot_max_nodes else "loop"

    # ---- operand layout / padding --------------------------------------------
    h_p = jnp.zeros((N_pad, F_pad), f32).at[:N, :F].set(h.astype(f32))
    # Fused stage-1 weight [W1a | W1b]; b1 folded into the Pa half only.
    w1cat = (jnp.zeros((F_pad, 2 * H_pad), f32)
             .at[:F, :H].set(jnp.transpose(W1[:, :F]).astype(f32))
             .at[:F, H_pad:H_pad + H].set(jnp.transpose(W1[:, F:]).astype(f32)))
    b1cat = jnp.zeros((1, 2 * H_pad), f32).at[0, :H].set(b1.astype(f32))
    w2_row = jnp.zeros((1, H_pad), f32).at[0, :H].set(W2[0].astype(f32))
    b2_s = b2.reshape((1,)).astype(f32)

    # Clamp + pad edge indices (padded edges point at node 0; their scores are dropped).
    src_i = jnp.zeros((E_pad,), jnp.int32).at[:E].set(
        jnp.clip(src_idx, 0, N - 1).astype(jnp.int32))
    dst_i = jnp.zeros((E_pad,), jnp.int32).at[:E].set(
        jnp.clip(dst_idx, 0, N - 1).astype(jnp.int32))

    # ---- stage 1: fused node projection ---------------------------------------
    n_tiles = N_pad // tile_n
    vmem1 = _vmem_limit_bytes(
        2 * 4 * (tile_n * F_pad + F_pad * 2 * H_pad + 2 * H_pad + 2 * tile_n * H_pad)
        + (8 << 20))
    pa, pb = pl.pallas_call(
        _node_proj_kernel,
        out_shape=(jax.ShapeDtypeStruct((N_pad, H_pad), f32),
                   jax.ShapeDtypeStruct((N_pad, H_pad), f32)),
        grid=(n_tiles,),
        in_specs=[
            pl.BlockSpec((tile_n, F_pad), lambda i: (i, 0)),
            pl.BlockSpec((F_pad, 2 * H_pad), lambda i: (0, 0)),   # grid-invariant weights
            pl.BlockSpec((1, 2 * H_pad), lambda i: (0, 0)),
        ],
        out_specs=(pl.BlockSpec((tile_n, H_pad), lambda i: (i, 0)),
                   pl.BlockSpec((tile_n, H_pad), lambda i: (i, 0))),
        compiler_params=pltpu.CompilerParams(
            dimension_semantics=("parallel",), vmem_limit_bytes=vmem1),
        cost_estimate=pl.CostEstimate(
            flops=4 * N_pad * F_pad * H_pad,
            transcendentals=0,
            bytes_accessed=4 * (N_pad * F_pad + 2 * F_pad * H_pad + 2 * N_pad * H_pad)),
    )(h_p, w1cat, b1cat)

    # ---- stage 2: edge scoring --------------------------------------------------
    # Note (v7x): megacore sharding of the edge grid duplicates the resident Pa/Pb
    # tables in each TensorCore's 64 MiB VMEM — budgeted for in vmem2 below.
    e_tiles = E_pad // TILE_E

    if gather == "onehot":
        src_col = src_i.reshape(E_pad, 1)
        dst_col = dst_i.reshape(E_pad, 1)
        vmem2 = _vmem_limit_bytes(
            2 * (2 * N_pad * H_pad * 4)                      # resident tables (+headroom)
            + 2 * 2 * TILE_E * 128 * 4                       # lane-padded index blocks x2 bufs
            + 4 * (2 * TILE_E * N_pad + 4 * TILE_E * H_pad)  # one-hot masks + activations
            + (4 << 20))
        scores_pad = pl.pallas_call(
            _edge_score_onehot_kernel,
            out_shape=jax.ShapeDtypeStruct((1, E_pad), f32),
            grid=(e_tiles,),
            in_specs=[
                pl.BlockSpec((TILE_E, 1), lambda i: (i, 0)),          # src column tile
                pl.BlockSpec((TILE_E, 1), lambda i: (i, 0)),          # dst column tile
                pl.BlockSpec((N_pad, H_pad), lambda i: (0, 0)),       # Pa (resident)
                pl.BlockSpec((N_pad, H_pad), lambda i: (0, 0)),       # Pb (resident)
                pl.BlockSpec((1, H_pad), lambda i: (0, 0)),           # w2 row
                pl.BlockSpec(memory_space=pltpu.MemorySpace.SMEM),    # b2 scalar
            ],
            out_specs=pl.BlockSpec((1, TILE_E), lambda i: (0, i)),
            compiler_params=pltpu.CompilerParams(
                dimension_semantics=("parallel",), vmem_limit_bytes=vmem2),
            cost_estimate=pl.CostEstimate(
                flops=4 * E_pad * N_pad * H_pad + 2 * E_pad * H_pad,
                transcendentals=0,
                bytes_accessed=4 * (2 * N_pad * H_pad + H_pad + E_pad) + 8 * E_pad),
        )(src_col, dst_col, pa, pb, w2_row, b2_s)
    else:
        vmem2 = _vmem_limit_bytes(
            2 * (2 * N_pad * H_pad * 4) + TILE_E * H_pad * 4 + (4 << 20))
        grid_spec = pltpu.PrefetchScalarGridSpec(
            num_scalar_prefetch=2,
            grid=(e_tiles,),
            in_specs=[
                pl.BlockSpec((N_pad, H_pad), lambda i, s, d: (0, 0)),   # Pa (resident)
                pl.BlockSpec((N_pad, H_pad), lambda i, s, d: (0, 0)),   # Pb (resident)
                pl.BlockSpec((1, H_pad), lambda i, s, d: (0, 0)),       # w2 row
                pl.BlockSpec(memory_space=pltpu.MemorySpace.SMEM),      # b2 scalar
            ],
            out_specs=pl.BlockSpec((1, TILE_E), lambda i, s, d: (0, i)),
            scratch_shapes=[pltpu.VMEM((TILE_E, H_pad), jnp.float32)],
        )
        scores_pad = pl.pallas_call(
            _edge_score_loop_kernel,
            out_shape=jax.ShapeDtypeStruct((1, E_pad), f32),
            grid_spec=grid_spec,
            compiler_params=pltpu.CompilerParams(
                dimension_semantics=("parallel",), vmem_limit_bytes=vmem2),
            cost_estimate=pl.CostEstimate(
                flops=4 * E_pad * H_pad,
                transcendentals=0,
                bytes_accessed=4 * (2 * N_pad * H_pad + H_pad + E_pad) + 8 * E_pad),
        )(src_i, dst_i, pa, pb, w2_row, b2_s)

    return scores_pad[0, :E]


def _torch_linear_init(key, out_f, in_f):
    # Deterministic init mimicking torch.nn.Linear default (uniform +/- 1/sqrt(fan_in)).
    kw, kb = jax.random.split(key)
    bound = 1.0 / math.sqrt(in_f)
    w = jax.random.uniform(kw, (out_f, in_f), jnp.float32, -bound, bound)
    b = jax.random.uniform(kb, (out_f,), jnp.float32, -bound, bound)
    return w, b


if __name__ == "__main__":
    key = jax.random.PRNGKey(0)
    k_h, k_w1, k_w2, k_src, k_dst = jax.random.split(key, 5)

    h_feats = 32
    num_nodes = 64
    num_edges = 600          # > TILE_E so the edge grid runs several tiles

    # Node features and a synthetic edge list (the "graph").
    h = jax.random.normal(k_h, (num_nodes, h_feats), jnp.float32)
    src_idx = jax.random.randint(k_src, (num_edges,), 0, num_nodes, jnp.int32)
    dst_idx = jax.random.randint(k_dst, (num_edges,), 0, num_nodes, jnp.int32)

    # Parameters: W1 = Linear(2*h_feats, h_feats), W2 = Linear(h_feats, 1)
    W1, b1 = _torch_linear_init(k_w1, h_feats, 2 * h_feats)
    W2, b2 = _torch_linear_init(k_w2, 1, h_feats)

    # Pure-JAX reference of the same forward pass.
    cat = jnp.concatenate([h[src_idx], h[dst_idx]], axis=1)
    ref = (jnp.maximum(cat @ W1.T + b1, 0.0) @ W2.T + b2)[:, 0]

    # Primary path: MXU one-hot gather (auto-selected for this node count).
    scores = mlp_predictor_pallas(h, src_idx, dst_idx, W1, b1, W2, b2)
    scores = jax.block_until_ready(scores)
    assert scores.shape == (num_edges,)
    assert jnp.allclose(scores, ref, atol=1e-3, rtol=1e-3), "one-hot path mismatch"

    # Fallback path: batched/unrolled row gather (used for large node counts).
    scores_loop = mlp_predictor_pallas(h, src_idx, dst_idx, W1, b1, W2, b2,
                                       gather="loop")
    scores_loop = jax.block_until_ready(scores_loop)
    assert scores_loop.shape == (num_edges,)
    assert jnp.allclose(scores_loop, ref, atol=1e-3, rtol=1e-3), "loop path mismatch"

    print("KERNEL_OK")
</pallas_src>

<mosaic_0001>
module attributes {stable_mosaic.version = 11 : i64} {
  func.func @_node_proj_kernel(%arg0: i32, %arg1: memref<128x128xf32, #tpu.memory_space<vmem>>, %arg2: memref<128x256xf32, #tpu.memory_space<vmem>>, %arg3: memref<1x256xf32, #tpu.memory_space<vmem>>, %arg4: memref<128x128xf32, #tpu.memory_space<vmem>>, %arg5: memref<128x128xf32, #tpu.memory_space<vmem>>) attributes {dimension_semantics = [#tpu.dimension_semantics<parallel>], iteration_bounds = array<i64: 1>, scalar_prefetch = 0 : i64, scratch_operands = 0 : i64, tpu.core_type = #tpu.core_type<tc>, window_params = [{transform_indices = @transform_0, window_bounds = array<i64: 128, 128>}, {pipeline_mode = #tpu.pipeline_mode<synchronous>, transform_indices = @transform_1, window_bounds = array<i64: 128, 256>}, {pipeline_mode = #tpu.pipeline_mode<synchronous>, transform_indices = @transform_2, window_bounds = array<i64: 1, 256>}, {transform_indices = @transform_3, window_bounds = array<i64: 128, 128>}, {transform_indices = @transform_4, window_bounds = array<i64: 128, 128>}]} {
    %c0 = arith.constant 0 : index
    %c0_0 = arith.constant 0 : index
    %0 = vector.load %arg1[%c0, %c0_0] : memref<128x128xf32, #tpu.memory_space<vmem>>, vector<128x128xf32>
    %c0_1 = arith.constant 0 : index
    %c0_2 = arith.constant 0 : index
    %1 = vector.load %arg2[%c0_1, %c0_2] : memref<128x256xf32, #tpu.memory_space<vmem>>, vector<128x256xf32>
    %cst = arith.constant dense<0.000000e+00> : vector<128x256xf32>
    %2 = tpu.matmul %0, %1, %cst {dimension_numbers = #tpu.dot_dimension_numbers<[1], [0], [0], [1], [0, 0, 1, 1], [], []>} : vector<128x128xf32>, vector<128x256xf32>, vector<128x256xf32> -> vector<128x256xf32>
    %c0_3 = arith.constant 0 : index
    %c0_4 = arith.constant 0 : index
    %3 = vector.load %arg3[%c0_3, %c0_4] : memref<1x256xf32, #tpu.memory_space<vmem>>, vector<1x256xf32>
    %4 = vector.broadcast %3 : vector<1x256xf32> to vector<128x256xf32>
    %5 = arith.addf %2, %4 : vector<128x256xf32>
    %6 = vector.extract_strided_slice %5 {offsets = [0, 0], sizes = [128, 128], strides = [1, 1]} : vector<128x256xf32> to vector<128x128xf32>
    %c0_5 = arith.constant 0 : index
    %c0_6 = arith.constant 0 : index
    %7 = vector.load %arg4[%c0_5, %c0_6] : memref<128x128xf32, #tpu.memory_space<vmem>>, vector<128x128xf32>
    tpu.vector_store %arg4[%c0_5, %c0_6], %6 {strides = array<i32>} : memref<128x128xf32, #tpu.memory_space<vmem>>, vector<128x128xf32>,
    %8 = vector.extract_strided_slice %5 {offsets = [0, 128], sizes = [128, 128], strides = [1, 1]} : vector<128x256xf32> to vector<128x128xf32>
    %c0_7 = arith.constant 0 : index
    %c0_8 = arith.constant 0 : index
    %9 = vector.load %arg5[%c0_7, %c0_8] : memref<128x128xf32, #tpu.memory_space<vmem>>, vector<128x128xf32>
    tpu.vector_store %arg5[%c0_7, %c0_8], %8 {strides = array<i32>} : memref<128x128xf32, #tpu.memory_space<vmem>>, vector<128x128xf32>,
    return
  }
  func.func @transform_0(%arg0: i32) -> (i32, i32) {
    %c0_i32 = arith.constant 0 : i32
    %c0_i32_0 = arith.constant 0 : i32
    return %arg0, %c0_i32 : i32, i32
  }
  func.func @transform_1(%arg0: i32) -> (i32, i32) {
    %c0_i32 = arith.constant 0 : i32
    %c0_i32_0 = arith.constant 0 : i32
    %c0_i32_1 = arith.constant 0 : i32
    return %c0_i32, %c0_i32_0 : i32, i32
  }
  func.func @transform_2(%arg0: i32) -> (i32, i32) {
    %c0_i32 = arith.constant 0 : i32
    %c0_i32_0 = arith.constant 0 : i32
    %c0_i32_1 = arith.constant 0 : i32
    return %c0_i32, %c0_i32_0 : i32, i32
  }
  func.func @transform_3(%arg0: i32) -> (i32, i32) {
    %c0_i32 = arith.constant 0 : i32
    %c0_i32_0 = arith.constant 0 : i32
    return %arg0, %c0_i32 : i32, i32
  }
  func.func @transform_4(%arg0: i32) -> (i32, i32) {
    %c0_i32 = arith.constant 0 : i32
    %c0_i32_0 = arith.constant 0 : i32
    return %arg0, %c0_i32 : i32, i32
  }
}

</mosaic_0001>

<bundles_post_ra>
// kernel: tpu_custom_call.1
= control target key start
LH: loop header
LB: loop body
LE: loop exit
PB: predicated region body
PF: predicated region fallthrough
CT: control target
= control target key end

     0   :  { %10 = vsyncpa [#allocation3], 0  ;;  %s639_s0 = inlined_call_operand.hbm [shape: f32[128,128], index: 0, kind: input, shape index: {}]   ;;  %s640_s1 = inlined_call_operand.hbm [shape: f32[128,256], index: 1, kind: input, shape index: {}]   ;;  %s641_s2 = inlined_call_operand.vmem [shape: f32[1,256], index: 2, kind: input, shape index: {}]   ;;  %s642_s3 = inlined_call_operand.hbm [shape: f32[128,128], index: 3, kind: output, shape index: {0}]   ;;  %s643_s4 = inlined_call_operand.hbm [shape: f32[128,128], index: 4, kind: output, shape index: {1}]  }
   0x1   :  { %11 = vsyncpa [#allocation6], 0 }
   0x2   :  { %12 = vsyncpa [#allocation4], 0 }
   0x3   :  { %13 = vsyncpa [#allocation9], 0  ;;  %s486_s15 = smov [#allocation2]   ;;  %s390_s19 = scalar_lea.hbm %s639_s0, 2048 }
   0x4   :  { %s19_s16 = sshll.u32 %s486_s15, 4  ;;  %p391_p0 = scmp.ne.s32.totalorder %s639_s0, %s390_s19  ;;  %s20_s16 = int_to_ptr.vmem [resolvable:$true] %s19_s16 }
   0x5   :  { %p394_p1 = scmp.lt.u32.totalorder %s390_s19, %s639_s0 }
   0x7   :  { %p396_p2 = pnand %p394_p1, %p391_p0 }
   0x9   :  { %399 = shalt.err (!%p396_p2)
}
   0xa   :  { %s400_s24 = scalar_lea.vmem %s20_s16, 2048  ;;  %p405_p4 = scmp.lt.s32.totalorder %s20_s16, %s20_s16 }
   0xb   :  { %p401_p3 = scmp.ne.s32.totalorder %s20_s16, %s400_s24  ;;  %p406_p5 = scmp.lt.s32.totalorder %s400_s24, %s400_s24 }
   0xd   :  { %p407_p6 = por %p406_p5, %p405_p4 }
   0xf   :  { %p408_p7 = pnand %p407_p6, %p401_p3 }
  0x11   :  { %411 = shalt.err (!%p408_p7)
}
  0x12   :  { %s487_s25 = smov 128   ;;  %s488_s26 = smov 8  }
  0x13   :  { %25 = dma.hbm_to_vmem [thread:$0]  %s639_s0, 2048, %s20_s16, [#allocation3], %s487_s25, %s487_s25, %s488_s26  }
  0x14   :  { %s489_s29 = smov [#allocation5]   ;;  %s412_s7 = scalar_lea.hbm %s640_s1, 4096 }
  0x15   :  { %s31_s30 = sshll.u32 %s489_s29, 4  ;;  %p413_p8 = scmp.ne.s32.totalorder %s640_s1, %s412_s7  ;;  %s32_s30 = int_to_ptr.vmem [resolvable:$true] %s31_s30 }
  0x16   :  { %p416_p9 = scmp.lt.u32.totalorder %s412_s7, %s640_s1 }
  0x18   :  { %p418_p10 = pnand %p416_p9, %p413_p8 }
  0x1a   :  { %421 = shalt.err (!%p418_p10)
}
  0x1b   :  { %s422_s12 = scalar_lea.vmem %s32_s30, 4096  ;;  %p427_p12 = scmp.lt.s32.totalorder %s32_s30, %s32_s30 }
  0x1c   :  { %p423_p11 = scmp.ne.s32.totalorder %s32_s30, %s422_s12  ;;  %p428_p13 = scmp.lt.s32.totalorder %s422_s12, %s422_s12 }
  0x1e   :  { %p429_p0 = por %p428_p13, %p427_p12 }
  0x20   :  { %p430_p1 = pnand %p429_p0, %p423_p11 }
  0x22   :  { %433 = shalt.err (!%p430_p1)
}
  0x23   :  { %s490_s0 = smov 256   ;;  %s491_s13 = smov 16  }
  0x24   :  { %37 = dma.hbm_to_vmem [thread:$0]  %s640_s1, 4096, %s32_s30, [#allocation6], %s490_s0, %s490_s0, %s491_s13  }
  0x25   :  { %478 = dma.done.wait [#allocation3], 2048  }
  0x26   :  { %479 = vsyncadd [#allocation3], 4294965248 }
  0x27   :  { %480 = dma.done.wait [#allocation6], 4096  }
  0x28   :  { %481 = vsyncadd [#allocation6], 4294963200  ;;  %v492_v0 = vmov 0.0   ;;  %v63_v1 = vld [vmem:[#allocation5 + $0x8] sm:$0xff]  ;;  %v65_v2 = vld [vmem:[#allocation5 + $0x18] sm:$0xff]  ;;  %s494_s18 = smov [#allocation8]  }
  0x29   :  { %170 = vmatprep.mubr.f32.mxu0 %v492_v0  ;;  %218 = vmatprep.mubr.f32.mxu1 %v492_v0  ;;  %v62_v3 = vld [vmem:[#allocation5] sm:$0xff]  ;;  %v333_v4 = vpack.c.bf16 %v65_v2, %v63_v1  ;;  %v64_v5 = vld [vmem:[#allocation5 + $0x10] sm:$0xff]  ;;  %v67_v6 = vld [vmem:[#allocation5 + $0x28] sm:$0xff]  ;;  %v96_v2 = vlaneseq  ;;  %s316_s19 = sshll.u32 %s494_s18, 4  ;;  %s602_s19 = int_to_ptr.vmem [resolvable:$true] %s316_s19 }
  0x2a   :  { %v69_v7 = vld [vmem:[#allocation5 + $0x38] sm:$0xff]  ;;  %v335_v8 = vpack.c.bf16 %v64_v5, %v62_v3  ;;  %v66_v10 = vld [vmem:[#allocation5 + $0x20] sm:$0xff]  ;;  %v68_v11 = vld [vmem:[#allocation5 + $0x30] sm:$0xff] }
  0x2b   :  { %v337_v9 = vpack.c.bf16 %v69_v7, %v67_v6  ;;  %v71_v12 = vld [vmem:[#allocation5 + $0x48] sm:$0xff]  ;;  %334 = vmatprep.subr.bf16.mxu0 %v333_v4  ;;  %365 = vmatprep.subr.bf16.mxu1 %v333_v4  ;;  %v73_v13 = vld [vmem:[#allocation5 + $0x58] sm:$0xff]  ;;  %v339_v14 = vpack.c.bf16 %v68_v11, %v66_v10  ;;  %v70_v16 = vld [vmem:[#allocation5 + $0x40] sm:$0xff]  ;;  %v97_v3 = vshrl.u32 %v96_v2, 7 }
  0x2c   :  { %336 = vmatpush1.bf16.msra.mxu0 %v335_v8  ;;  %373 = vmatpush1.bf16.msra.mxu1 %v335_v8  ;;  %v341_v15 = vpack.c.bf16 %v73_v13, %v71_v12  ;;  %v72_v17 = vld [vmem:[#allocation5 + $0x50] sm:$0xff]  ;;  %v75_v18 = vld [vmem:[#allocation5 + $0x68] sm:$0xff]  ;;  %v77_v19 = vld [vmem:[#allocation5 + $0x78] sm:$0xff] }
  0x2d   :  { %338 = vmatprep.subr.bf16.mxu0 %v337_v9  ;;  %366 = vmatprep.subr.bf16.mxu1 %v337_v9  ;;  %v343_v20 = vpack.c.bf16 %v72_v17, %v70_v16  ;;  %v345_v21 = vpack.c.bf16 %v77_v19, %v75_v18  ;;  %v74_v22 = vld [vmem:[#allocation5 + $0x60] sm:$0xff]  ;;  %v76_v23 = vld [vmem:[#allocation5 + $0x70] sm:$0xff]  ;;  %v79_v24 = vld [vmem:[#allocation5 + $0x88] sm:$0xff]  ;;  %v98_v4 = vsub.s32 0, %v97_v3  ;;  %v102_v6 = vsub.s32 1, %v97_v3 }
  0x2e   :  { %v81_v25 = vld [vmem:[#allocation5 + $0x98] sm:$0xff]  ;;  %v347_v26 = vpack.c.bf16 %v76_v23, %v74_v22  ;;  %v78_v28 = vld [vmem:[#allocation5 + $0x80] sm:$0xff]  ;;  %v80_v29 = vld [vmem:[#allocation5 + $0x90] sm:$0xff] }
  0x2f   :  { %v349_v27 = vpack.c.bf16 %v81_v25, %v79_v24  ;;  %v83_v30 = vld [vmem:[#allocation5 + $0xa8] sm:$0xff]  ;;  %v85_v31 = vld [vmem:[#allocation5 + $0xb8] sm:$0xff]  ;;  %v351_v32 = vpack.c.bf16 %v80_v29, %v78_v28  ;;  %v82_v34 = vld [vmem:[#allocation5 + $0xa0] sm:$0xff] }
  0x30   :  { %340 = vmatpush1.bf16.msra.mxu0 %v339_v14  ;;  %374 = vmatpush1.bf16.msra.mxu1 %v339_v14  ;;  %v353_v33 = vpack.c.bf16 %v85_v31, %v83_v30  ;;  %v84_v35 = vld [vmem:[#allocation5 + $0xb0] sm:$0xff]  ;;  %v87_v36 = vld [vmem:[#allocation5 + $0xc8] sm:$0xff]  ;;  %v89_v37 = vld [vmem:[#allocation5 + $0xd8] sm:$0xff] }
  0x31   :  { %342 = vmatprep.subr.bf16.mxu0 %v341_v15  ;;  %367 = vmatprep.subr.bf16.mxu1 %v341_v15  ;;  %v355_v38 = vpack.c.bf16 %v84_v35, %v82_v34  ;;  %v357_v39 = vpack.c.bf16 %v89_v37, %v87_v36  ;;  %v86_v40 = vld [vmem:[#allocation5 + $0xc0] sm:$0xff]  ;;  %v88_v41 = vld [vmem:[#allocation5 + $0xd0] sm:$0xff]  ;;  %v91_v42 = vld [vmem:[#allocation5 + $0xe8] sm:$0xff] }
  0x32   :  { %v93_v43 = vld [vmem:[#allocation5 + $0xf8] sm:$0xff]  ;;  %v359_v44 = vpack.c.bf16 %v88_v41, %v86_v40  ;;  %v90_v46 = vld [vmem:[#allocation5 + $0xe0] sm:$0xff]  ;;  %v92_v47 = vld [vmem:[#allocation5 + $0xf0] sm:$0xff] }
  0x33   :  { %v361_v45 = vpack.c.bf16 %v93_v43, %v91_v42  ;;  %v363_v48 = vpack.c.bf16 %v92_v47, %v90_v46  ;;  %v46_v49 = vld [vmem:[#allocation2] sm:$0xff]  ;;  %v47_v51 = vld [vmem:[#allocation2 + $0x8] sm:$0xff]  ;;  %v48_v53 = vld [vmem:[#allocation2 + $0x10] sm:$0xff] }
  0x34   :  { %344 = vmatpush1.bf16.msra.mxu0 %v343_v20  ;;  %375 = vmatpush1.bf16.msra.mxu1 %v343_v20  ;;  %v54_v50 = vld [vmem:[#allocation2 + $0x40] sm:$0xff]  ;;  %v55_v52 = vld [vmem:[#allocation2 + $0x48] sm:$0xff]  ;;  %v56_v54 = vld [vmem:[#allocation2 + $0x50] sm:$0xff] }
  0x35   :  { %346 = vmatprep.subr.bf16.mxu0 %v345_v21  ;;  %368 = vmatprep.subr.bf16.mxu1 %v345_v21  ;;  %v49_v55 = vld [vmem:[#allocation2 + $0x18] sm:$0xff]  ;;  %v50_v57 = vld [vmem:[#allocation2 + $0x20] sm:$0xff]  ;;  %v51_v59 = vld [vmem:[#allocation2 + $0x28] sm:$0xff] }
  0x36   :  { %v57_v56 = vld [vmem:[#allocation2 + $0x58] sm:$0xff]  ;;  %v58_v58 = vld [vmem:[#allocation2 + $0x60] sm:$0xff]  ;;  %v59_v60 = vld [vmem:[#allocation2 + $0x68] sm:$0xff] }
  0x37   :  { %v52_v61 = vld [vmem:[#allocation2 + $0x30] sm:$0xff]  ;;  %v53_v63 = vld [vmem:[#allocation2 + $0x38] sm:$0xff]  ;;  %v94_v5 = vld [vmem:[%s641_s2] sm:$0x3]  ;;  %s493_s2 = smov [#allocation7]  }
  0x38   :  { %348 = vmatpush1.bf16.msra.mxu0 %v347_v26  ;;  %376 = vmatpush1.bf16.msra.mxu1 %v347_v26  ;;  %v60_v62 = vld [vmem:[#allocation2 + $0x70] sm:$0xff]  ;;  %v61_v1 = vld [vmem:[#allocation2 + $0x78] sm:$0xff]  ;;  %v566_v7 = vrot.slane %v94_v5, %v98_v4  ;;  %v568_v8 = vrot.slane %v94_v5, %v102_v6  ;;  %s304_s17 = sshll.u32 %s493_s2, 4  ;;  %s305_s17 = int_to_ptr.vmem [resolvable:$true] %s304_s17 }
  0x39   :  { %350 = vmatprep.subr.bf16.mxu0 %v349_v27  ;;  %369 = vmatprep.subr.bf16.mxu1 %v349_v27  ;;  %s434_s20 = scalar_lea.vmem %s305_s17, 2048  ;;  %p439_p3 = scmp.lt.s32.totalorder %s305_s17, %s305_s17 }
  0x3a   :  { %p435_p2 = scmp.ne.s32.totalorder %s305_s17, %s434_s20  ;;  %p440_p4 = scmp.lt.s32.totalorder %s434_s20, %s434_s20 }
  0x3c   :  { %352 = vmatpush1.bf16.msra.mxu0 %v351_v32  ;;  %377 = vmatpush1.bf16.msra.mxu1 %v351_v32  ;;  %p441_p5 = por %p440_p4, %p439_p3 }
  0x3d   :  { %354 = vmatprep.subr.bf16.mxu0 %v353_v33  ;;  %370 = vmatprep.subr.bf16.mxu1 %v353_v33 }
  0x3e   :  { %p442_p6 = pnand %p441_p5, %p435_p2 }
  0x40   :  { %356 = vmatpush1.bf16.msra.mxu0 %v355_v38  ;;  %378 = vmatpush1.bf16.msra.mxu1 %v355_v38 }
  0x41   :  { %358 = vmatprep.subr.bf16.mxu0 %v357_v39  ;;  %371 = vmatprep.subr.bf16.mxu1 %v357_v39 }
  0x44   :  { %360 = vmatpush1.bf16.msra.mxu0 %v359_v44  ;;  %379 = vmatpush1.bf16.msra.mxu1 %v359_v44 }
  0x45   :  { %362 = vmatprep.subr.bf16.mxu0 %v361_v45  ;;  %372 = vmatprep.subr.bf16.mxu1 %v361_v45 }
  0x48   :  { %364 = vmatpush1.bf16.msra.mxu0 %v363_v48  ;;  %380 = vmatpush1.bf16.msra.mxu1 %v363_v48 }
  0x4b   :  { %171 = vmatmul.mubr.f32.vlgmr.msra.gmra.mrb[0].mxu0 %v46_v49  ;;  %219 = vmatmul.mubr.f32.vlgmr.msra.gmra.mrb[0].mxu1 %v54_v50 }
  0x4c   :  { %176 = vmatprep.mubr.f32.mxu0 %v492_v0  ;;  %224 = vmatprep.mubr.f32.mxu1 %v492_v0 }
  0x4f   :  { %177 = vmatmul.mubr.f32.gmra.mrb[2].mxu0 %v47_v51  ;;  %225 = vmatmul.mubr.f32.gmra.mrb[2].mxu1 %v55_v52 }
  0x50   :  { %182 = vmatprep.mubr.f32.mxu0 %v492_v0  ;;  %230 = vmatprep.mubr.f32.mxu1 %v492_v0 }
  0x53   :  { %183 = vmatmul.mubr.f32.gmra.mrb[4].mxu0 %v48_v53  ;;  %231 = vmatmul.mubr.f32.gmra.mrb[4].mxu1 %v56_v54 }
  0x54   :  { %188 = vmatprep.mubr.f32.mxu0 %v492_v0  ;;  %236 = vmatprep.mubr.f32.mxu1 %v492_v0 }
  0x57   :  { %189 = vmatmul.mubr.f32.gmra.mrb[6].mxu0 %v49_v55  ;;  %237 = vmatmul.mubr.f32.gmra.mrb[6].mxu1 %v57_v56 }
  0x58   :  { %194 = vmatprep.mubr.f32.mxu0 %v492_v0  ;;  %242 = vmatprep.mubr.f32.mxu1 %v492_v0 }
  0x5b   :  { %195 = vmatmul.mubr.f32.gmra.mrb[8].mxu0 %v50_v57  ;;  %243 = vmatmul.mubr.f32.gmra.mrb[8].mxu1 %v58_v58 }
  0x5c   :  { %200 = vmatprep.mubr.f32.mxu0 %v492_v0  ;;  %248 = vmatprep.mubr.f32.mxu1 %v492_v0 }
  0x5f   :  { %201 = vmatmul.mubr.f32.gmra.mrb[10].mxu0 %v51_v59  ;;  %249 = vmatmul.mubr.f32.gmra.mrb[10].mxu1 %v59_v60 }
  0x60   :  { %206 = vmatprep.mubr.f32.mxu0 %v492_v0  ;;  %254 = vmatprep.mubr.f32.mxu1 %v492_v0 }
  0x63   :  { %207 = vmatmul.mubr.f32.gmra.mrb[12].mxu0 %v52_v61  ;;  %255 = vmatmul.mubr.f32.gmra.mrb[12].mxu1 %v60_v62 }
  0x64   :  { %212 = vmatprep.mubr.f32.mxu0 %v492_v0  ;;  %260 = vmatprep.mubr.f32.mxu1 %v492_v0 }
  0x67   :  { %213 = vmatmul.mubr.f32.gmra.mrb[14].mxu0 %v53_v63  ;;  %261 = vmatmul.mubr.f32.gmra.mrb[14].mxu1 %v61_v1 }
 0x11e   :  { %v172_v9 = vpop.f32.mrb[0].mxu0  ;;  %v220_v10 = vpop.f32.mrb[0].mxu1 }
 0x11f   :  { %v173_v0 = vadd.f32 %v172_v9, %v566_v7  ;;  %v221_v11 = vadd.f32 %v220_v10, %v566_v7  ;;  %v174_v12 = vpop.f32.mrb[1].mxu0  ;;  %v222_v13 = vpop.f32.mrb[1].mxu1 }
 0x120   :  { %v175_v14 = vadd.f32 %v174_v12, %v568_v8  ;;  %v223_v15 = vadd.f32 %v222_v13, %v568_v8 }
 0x121   :  { %267 = vst [vmem:[#allocation7] sm:$0xff] %v173_v0  ;;  %275 = vst [vmem:[#allocation7 + $0x40] sm:$0xff] %v221_v11 }
 0x122   :  { %283 = vst [vmem:[#allocation8] sm:$0xff] %v175_v14  ;;  %291 = vst [vmem:[#allocation8 + $0x40] sm:$0xff] %v223_v15  ;;  %v178_v16 = vpop.f32.mrb[2].mxu0  ;;  %v226_v17 = vpop.f32.mrb[2].mxu1 }
 0x123   :  { %v179_v18 = vadd.f32 %v178_v16, %v566_v7  ;;  %v227_v19 = vadd.f32 %v226_v17, %v566_v7  ;;  %v180_v20 = vpop.f32.mrb[3].mxu0  ;;  %v228_v21 = vpop.f32.mrb[3].mxu1 }
 0x124   :  { %v181_v22 = vadd.f32 %v180_v20, %v568_v8  ;;  %v229_v23 = vadd.f32 %v228_v21, %v568_v8 }
 0x125   :  { %268 = vst [vmem:[#allocation7 + $0x8] sm:$0xff] %v179_v18  ;;  %276 = vst [vmem:[#allocation7 + $0x48] sm:$0xff] %v227_v19 }
 0x126   :  { %284 = vst [vmem:[#allocation8 + $0x8] sm:$0xff] %v181_v22  ;;  %292 = vst [vmem:[#allocation8 + $0x48] sm:$0xff] %v229_v23  ;;  %v184_v24 = vpop.f32.mrb[4].mxu0  ;;  %v232_v25 = vpop.f32.mrb[4].mxu1 }
 0x127   :  { %v185_v26 = vadd.f32 %v184_v24, %v566_v7  ;;  %v233_v27 = vadd.f32 %v232_v25, %v566_v7  ;;  %v186_v28 = vpop.f32.mrb[5].mxu0  ;;  %v234_v29 = vpop.f32.mrb[5].mxu1 }
 0x128   :  { %v187_v30 = vadd.f32 %v186_v28, %v568_v8  ;;  %v235_v31 = vadd.f32 %v234_v29, %v568_v8 }
 0x129   :  { %269 = vst [vmem:[#allocation7 + $0x10] sm:$0xff] %v185_v26  ;;  %277 = vst [vmem:[#allocation7 + $0x50] sm:$0xff] %v233_v27 }
 0x12a   :  { %285 = vst [vmem:[#allocation8 + $0x10] sm:$0xff] %v187_v30  ;;  %293 = vst [vmem:[#allocation8 + $0x50] sm:$0xff] %v235_v31  ;;  %v190_v32 = vpop.f32.mrb[6].mxu0  ;;  %v238_v33 = vpop.f32.mrb[6].mxu1 }
 0x12b   :  { %v191_v34 = vadd.f32 %v190_v32, %v566_v7  ;;  %v239_v35 = vadd.f32 %v238_v33, %v566_v7  ;;  %v192_v36 = vpop.f32.mrb[7].mxu0  ;;  %v240_v37 = vpop.f32.mrb[7].mxu1 }
 0x12c   :  { %v193_v38 = vadd.f32 %v192_v36, %v568_v8  ;;  %v241_v39 = vadd.f32 %v240_v37, %v568_v8 }
 0x12d   :  { %270 = vst [vmem:[#allocation7 + $0x18] sm:$0xff] %v191_v34  ;;  %278 = vst [vmem:[#allocation7 + $0x58] sm:$0xff] %v239_v35 }
 0x12e   :  { %286 = vst [vmem:[#allocation8 + $0x18] sm:$0xff] %v193_v38  ;;  %294 = vst [vmem:[#allocation8 + $0x58] sm:$0xff] %v241_v39  ;;  %v196_v40 = vpop.f32.mrb[8].mxu0  ;;  %v244_v41 = vpop.f32.mrb[8].mxu1 }
 0x12f   :  { %v197_v42 = vadd.f32 %v196_v40, %v566_v7  ;;  %v245_v43 = vadd.f32 %v244_v41, %v566_v7  ;;  %v198_v44 = vpop.f32.mrb[9].mxu0  ;;  %v246_v45 = vpop.f32.mrb[9].mxu1 }
 0x130   :  { %v199_v46 = vadd.f32 %v198_v44, %v568_v8  ;;  %v247_v47 = vadd.f32 %v246_v45, %v568_v8 }
 0x131   :  { %271 = vst [vmem:[#allocation7 + $0x20] sm:$0xff] %v197_v42  ;;  %279 = vst [vmem:[#allocation7 + $0x60] sm:$0xff] %v245_v43 }
 0x132   :  { %287 = vst [vmem:[#allocation8 + $0x20] sm:$0xff] %v199_v46  ;;  %295 = vst [vmem:[#allocation8 + $0x60] sm:$0xff] %v247_v47  ;;  %v202_v48 = vpop.f32.mrb[10].mxu0  ;;  %v250_v49 = vpop.f32.mrb[10].mxu1 }
 0x133   :  { %v203_v50 = vadd.f32 %v202_v48, %v566_v7  ;;  %v251_v51 = vadd.f32 %v250_v49, %v566_v7  ;;  %v204_v52 = vpop.f32.mrb[11].mxu0  ;;  %v252_v53 = vpop.f32.mrb[11].mxu1 }
 0x134   :  { %v205_v54 = vadd.f32 %v204_v52, %v568_v8  ;;  %v253_v55 = vadd.f32 %v252_v53, %v568_v8 }
 0x135   :  { %272 = vst [vmem:[#allocation7 + $0x28] sm:$0xff] %v203_v50  ;;  %280 = vst [vmem:[#allocation7 + $0x68] sm:$0xff] %v251_v51 }
 0x136   :  { %288 = vst [vmem:[#allocation8 + $0x28] sm:$0xff] %v205_v54  ;;  %296 = vst [vmem:[#allocation8 + $0x68] sm:$0xff] %v253_v55  ;;  %v208_v56 = vpop.f32.mrb[12].mxu0  ;;  %v256_v57 = vpop.f32.mrb[12].mxu1 }
 0x137   :  { %v209_v58 = vadd.f32 %v208_v56, %v566_v7  ;;  %v257_v59 = vadd.f32 %v256_v57, %v566_v7  ;;  %v210_v60 = vpop.f32.mrb[13].mxu0  ;;  %v258_v61 = vpop.f32.mrb[13].mxu1 }
 0x138   :  { %v211_v62 = vadd.f32 %v210_v60, %v568_v8  ;;  %v259_v63 = vadd.f32 %v258_v61, %v568_v8 }
 0x139   :  { %273 = vst [vmem:[#allocation7 + $0x30] sm:$0xff] %v209_v58  ;;  %281 = vst [vmem:[#allocation7 + $0x70] sm:$0xff] %v257_v59 }
 0x13a   :  { %289 = vst [vmem:[#allocation8 + $0x30] sm:$0xff] %v211_v62  ;;  %297 = vst [vmem:[#allocation8 + $0x70] sm:$0xff] %v259_v63  ;;  %v214_v1 = vpop.f32.mrb[14].mxu0  ;;  %v262_v2 = vpop.f32.mrb[14].mxu1 }
 0x13b   :  { %v215_v3 = vadd.f32 %v214_v1, %v566_v7  ;;  %v263_v4 = vadd.f32 %v262_v2, %v566_v7  ;;  %v216_v5 = vpop.f32.mrb[15].mxu0  ;;  %v264_v6 = vpop.f32.mrb[15].mxu1 }
 0x13c   :  { %v217_v9 = vadd.f32 %v216_v5, %v568_v8  ;;  %v265_v10 = vadd.f32 %v264_v6, %v568_v8 }
 0x13d   :  { %274 = vst [vmem:[#allocation7 + $0x38] sm:$0xff] %v215_v3  ;;  %282 = vst [vmem:[#allocation7 + $0x78] sm:$0xff] %v263_v4 }
 0x13e   :  { %290 = vst [vmem:[#allocation8 + $0x38] sm:$0xff] %v217_v9  ;;  %298 = vst [vmem:[#allocation8 + $0x78] sm:$0xff] %v265_v10 }
 0x13f   :  { %445 = shalt.err (!%p442_p6)
}
 0x140   :  { %s446_s23 = scalar_lea.hbm %s642_s3, 2048 }
 0x141   :  { %p447_p7 = scmp.ne.s32.totalorder %s642_s3, %s446_s23  ;;  %p450_p8 = scmp.lt.u32.totalorder %s446_s23, %s642_s3 }
 0x143   :  { %p452_p9 = pnand %p450_p8, %p447_p7 }
 0x145   :  { %455 = shalt.err (!%p452_p9)
}
 0x146   :  { %310 = dma.vmem_to_hbm [thread:$0]  %s305_s17, 2048, %s642_s3, [#allocation4], %s487_s25, %s487_s25, %s488_s26  }
 0x147   :  { %s456_s6 = scalar_lea.vmem %s602_s19, 2048  ;;  %p461_p11 = scmp.lt.s32.totalorder %s602_s19, %s602_s19 }
 0x148   :  { %p457_p10 = scmp.ne.s32.totalorder %s602_s19, %s456_s6  ;;  %p462_p12 = scmp.lt.s32.totalorder %s456_s6, %s456_s6 }
 0x14a   :  { %p463_p13 = por %p462_p12, %p461_p11 }
 0x14c   :  { %p464_p0 = pnand %p463_p13, %p457_p10 }
 0x14e   :  { %467 = shalt.err (!%p464_p0)
}
 0x14f   :  { %s468_s9 = scalar_lea.hbm %s643_s4, 2048 }
 0x150   :  { %p469_p1 = scmp.ne.s32.totalorder %s643_s4, %s468_s9  ;;  %p472_p2 = scmp.lt.u32.totalorder %s468_s9, %s643_s4 }
 0x152   :  { %p474_p3 = pnand %p472_p2, %p469_p1 }
 0x154   :  { %477 = shalt.err (!%p474_p3)
}
 0x155   :  { %322 = dma.vmem_to_hbm [thread:$0]  %s602_s19, 2048, %s643_s4, [#allocation9], %s487_s25, %s487_s25, %s488_s26  }
 0x156   :  { %482 = dma.done.wait [#allocation4], 2048  }
 0x157   :  { %483 = vsyncadd [#allocation4], 4294965248 }
 0x158   :  { %484 = dma.done.wait [#allocation9], 2048  }
 0x159   :  { %485 = vsyncadd [#allocation9], 4294965248 }
 0x15a   :  { %329 = vsyncpa [#allocation3], 1 }
 0x15b   :  { %330 = vsyncpa [#allocation6], 1 }
 0x15c   :  { %331 = vsyncpa [#allocation4], 1 }
 0x15d   :  { %332 = vsyncpa [#allocation9], 1 }

</bundles_post_ra>
